<compile_context>
chip_gen: v7x
topology: tpu7x:2x2x1
jax: 0.10.0
libtpu: 0.0.40
codegen_flags: <defaults>
</compile_context>

<pallas_src>
from functools import partial

import jax
import jax.numpy as jnp
from jax.experimental import pallas as pl
from jax.experimental.pallas import tpu as pltpu

EPS = 1e-5


# ---------------------------------------------------------------------------
# In-kernel building blocks (per-sample values: (C, M) with M = H*W on lanes)
# ---------------------------------------------------------------------------
def _roll_lanes(a, k):
    """jnp.roll semantics along the last (lane) axis via the XLU rotate."""
    m = a.shape[-1]
    k = k % m
    if k == 0:
        return a
    return pltpu.roll(a, k, axis=a.ndim - 1)


def _boundary_masks(H, W):
    """Boundary masks of ReflectionPad2d(1) at minimal shape (1, M)."""
    M = H * W
    lane = jax.lax.broadcasted_iota(jnp.int32, (1, M), 1)
    if (W & (W - 1)) == 0:
        col = jnp.bitwise_and(lane, W - 1)
    else:
        col = lane % W
    row0 = lane < W                  # y == 0
    rowL = lane >= (M - W)           # y == H-1
    col0 = col == 0                  # x == 0
    colL = col == (W - 1)            # x == W-1
    return row0, rowL, col0, colL


def _conv3x3_reflect(h, w_flat, taps_ref, masks, W):
    """Reflect-padded 3x3 conv as ONE K=9*C MXU dot (per sample).

    h:        (C, M) f32, M = H*W flattened row-major.
    w_flat:   (Cout, 9*C) in the matmul dtype, K ordered (ky, kx, cin).
    taps_ref: VMEM scratch with >= 9*C rows x M lanes (matmul dtype).
    masks:    (1, M) boundary masks from _boundary_masks.
    Returns (Cout, M) f32 (f32 accumulation on the MXU).
    """
    C, M = h.shape
    # Broadcast masks once per conv so the selects below don't re-broadcast.
    row0, rowL, col0, colL = (jnp.broadcast_to(m, (C, M)) for m in masks)

    up = _roll_lanes(h, -W)           # value at (y+1, x)
    dn = _roll_lanes(h, W)            # value at (y-1, x)
    r_m1 = jnp.where(row0, up, dn)    # padded row y-1 (reflects to row 1)
    r_p1 = jnp.where(rowL, dn, up)    # padded row y+1 (reflects to row H-2)

    dt = taps_ref.dtype
    for ky, r in enumerate((r_m1, h, r_p1)):          # ky = 0, 1, 2
        rt = _roll_lanes(r, -1)                       # value at column x+1
        lf = _roll_lanes(r, 1)                        # value at column x-1
        base = ky * 3 * C
        # kx = 0: padded col x-1 ; kx = 1: col x ; kx = 2: padded col x+1
        taps_ref[pl.ds(base + 0 * C, C), :] = jnp.where(col0, rt, lf).astype(dt)
        taps_ref[pl.ds(base + 1 * C, C), :] = r.astype(dt)
        taps_ref[pl.ds(base + 2 * C, C), :] = jnp.where(colL, lf, rt).astype(dt)

    return jnp.dot(w_flat, taps_ref[pl.ds(0, 9 * C), :],
                   preferred_element_type=jnp.float32)


def _adailn(h, gamma, beta, omega):
    """Fused AdaILN with two-pass (centered) variance.

    h: (C, M) f32; gamma/beta/omega: (C, 1) f32.
    """
    C, M = h.shape
    s1 = jnp.sum(h, axis=1, keepdims=True)                     # (C, 1)
    mean_in = s1 * (1.0 / M)
    d = h - mean_in
    ss_in = jnp.sum(d * d, axis=1, keepdims=True)              # (C, 1)
    var_in = ss_in * (1.0 / (M - 1))                           # unbiased

    mean_ln = jnp.sum(s1, axis=0, keepdims=True) * (1.0 / (C * M))   # (1, 1)
    dm = mean_in - mean_ln
    ss_ln = jnp.sum(ss_in + M * dm * dm, axis=0, keepdims=True)      # (1, 1)
    var_ln = ss_ln * (1.0 / (C * M - 1))

    r_in = jax.lax.rsqrt(var_in + EPS)
    r_ln = jax.lax.rsqrt(var_ln + EPS)
    # Collapse the IN/LN blend + gamma/beta into one affine per channel:
    #   out = h * A + B
    a = omega * r_in + (1.0 - omega) * r_ln
    b = omega * mean_in * r_in + (1.0 - omega) * mean_ln * r_ln
    A = gamma * a
    B = beta - gamma * b
    return h * A + B


# ---------------------------------------------------------------------------
# Kernel: one sample per grid step (grid axis is "parallel" -> 2 TCs on v7x)
# ---------------------------------------------------------------------------
def _dyn_resblock_kernel(x_ref, gamma_ref, beta_ref, omega_ref,
                         w1_ref, w2_ref, out_ref, taps_ref, *, H, W, use_res):
    x = x_ref[0]                         # (Cin, M) f32, lane-dense
    gamma = gamma_ref[0]                 # (Cb, 1) f32
    beta = beta_ref[0]
    omega = omega_ref[0]

    # Boundary masks built once per invocation at minimal (1, M) shape.
    masks = _boundary_masks(H, W)

    h = _conv3x3_reflect(x, w1_ref[...], taps_ref, masks, W)
    h = _adailn(h, gamma, beta, omega)
    h = jnp.maximum(h, 0.0)              # ReLU
    h = _conv3x3_reflect(h, w2_ref[...], taps_ref, masks, W)
    h = _adailn(h, gamma, beta, omega)
    if use_res:
        h = h + x
    out_ref[0] = h.astype(out_ref.dtype)


# ---------------------------------------------------------------------------
# Wrapper (NCHW / OIHW interface, like the PyTorch module)
# ---------------------------------------------------------------------------
def dynamic_res_block(x_nchw, gamma, beta, omega, w1_oihw, w2_oihw,
                      *, matmul_dtype=jnp.float32):
    N, Cin, H, W = x_nchw.shape
    Cb = w1_oihw.shape[0]
    Cout = w2_oihw.shape[0]
    assert H >= 2 and W >= 2, "ReflectionPad2d(1) requires spatial dims >= 2"
    use_res = (Cin == Cout)
    M = H * W

    # NCHW -> (N, C, H*W): a pure reshape (no transpose / extra HBM pass);
    # spatial goes on the lane axis (M = 256, a multiple of 128 for H=W=16).
    x_cm = x_nchw.reshape(N, Cin, M).astype(jnp.float32)

    # OIHW -> (Cout, 9*Cin) with K ordered (ky, kx, cin): one dot per conv.
    w1f = jnp.transpose(w1_oihw, (0, 2, 3, 1)).reshape(Cb, 9 * Cin)
    w2f = jnp.transpose(w2_oihw, (0, 2, 3, 1)).reshape(Cout, 9 * Cb)
    w1f = w1f.astype(matmul_dtype)
    w2f = w2f.astype(matmul_dtype)

    g = gamma.reshape(N, Cb, 1).astype(jnp.float32)
    b = beta.reshape(N, Cb, 1).astype(jnp.float32)
    o = omega.reshape(N, Cb, 1).astype(jnp.float32)

    kernel = partial(_dyn_resblock_kernel, H=H, W=W, use_res=use_res)
    kmax = 9 * max(Cin, Cb)              # tap-slab rows for either conv

    out = pl.pallas_call(
        kernel,
        out_shape=jax.ShapeDtypeStruct((N, Cout, M), jnp.float32),
        grid_spec=pltpu.PrefetchScalarGridSpec(
            num_scalar_prefetch=0,
            grid=(N,),                   # one sample per step, parallel axis
            in_specs=[
                pl.BlockSpec((1, Cin, M), lambda n: (n, 0, 0)),
                pl.BlockSpec((1, Cb, 1), lambda n: (n, 0, 0)),
                pl.BlockSpec((1, Cb, 1), lambda n: (n, 0, 0)),
                pl.BlockSpec((1, Cb, 1), lambda n: (n, 0, 0)),
                pl.BlockSpec((Cb, 9 * Cin), lambda n: (0, 0)),
                pl.BlockSpec((Cout, 9 * Cb), lambda n: (0, 0)),
            ],
            out_specs=pl.BlockSpec((1, Cout, M), lambda n: (n, 0, 0)),
            scratch_shapes=[pltpu.VMEM((kmax, M), matmul_dtype)],
        ),
        compiler_params=pltpu.CompilerParams(
            dimension_semantics=("parallel",)),
    )(x_cm, g, b, o, w1f, w2f)

    # (N, Cout, H*W) -> NCHW is again a pure reshape.
    return out.reshape(N, Cout, H, W)


# ---------------------------------------------------------------------------
# Pure-JAX reference (for correctness check only)
# ---------------------------------------------------------------------------
def _reference(x, gamma, beta, omega, w1, w2):
    def pad(a):
        return jnp.pad(a, ((0, 0), (0, 0), (1, 1), (1, 1)), mode="reflect")

    def conv(a, w):
        return jax.lax.conv_general_dilated(
            a, w, (1, 1), "VALID",
            dimension_numbers=("NCHW", "OIHW", "NCHW"))

    def adailn(a, g, b, o):
        in_mean = jnp.mean(a, axis=(2, 3), keepdims=True)
        in_var = jnp.var(a, axis=(2, 3), keepdims=True, ddof=1)
        out_in = (a - in_mean) / jnp.sqrt(in_var + EPS)
        ln_mean = jnp.mean(a, axis=(1, 2, 3), keepdims=True)
        ln_var = jnp.var(a, axis=(1, 2, 3), keepdims=True, ddof=1)
        out_ln = (a - ln_mean) / jnp.sqrt(ln_var + EPS)
        g = g[:, :, None, None]
        b = b[:, :, None, None]
        o = o[:, :, None, None]
        return (o * out_in + (1.0 - o) * out_ln) * g + b

    h = conv(pad(x), w1)
    h = adailn(h, gamma, beta, omega)
    h = jnp.maximum(h, 0.0)
    h = conv(pad(h), w2)
    h = adailn(h, gamma, beta, omega)
    if x.shape[1] == w2.shape[0]:
        h = x + h
    return h


if __name__ == "__main__":
    # in_ch = gamma_dim = beta_dim = omega_dim = out_ch = 8 -> residual used.
    N, C, H, W = 2, 8, 16, 16
    key = jax.random.PRNGKey(0)
    ks = jax.random.split(key, 6)
    x = jax.random.normal(ks[0], (N, C, H, W), jnp.float32)
    style_gamma = jax.random.normal(ks[1], (N, C), jnp.float32)
    style_beta = jax.random.normal(ks[2], (N, C), jnp.float32)
    style_omega = jax.nn.sigmoid(jax.random.normal(ks[3], (N, C), jnp.float32))
    w1 = 0.1 * jax.random.normal(ks[4], (C, C, 3, 3), jnp.float32)  # OIHW
    w2 = 0.1 * jax.random.normal(ks[5], (C, C, 3, 3), jnp.float32)  # OIHW

    ref = _reference(x, style_gamma, style_beta, style_omega, w1, w2)

    # Default path: f32 matmul operands, checked tightly against the reference.
    out = dynamic_res_block(x, style_gamma, style_beta, style_omega, w1, w2)
    out = jax.block_until_ready(out)
    assert out.shape == (N, C, H, W)
    assert jnp.allclose(out, ref, rtol=1e-4, atol=1e-4), \
        float(jnp.max(jnp.abs(out - ref)))

    # Optional bf16 matmul operands (for large C on v6e/v7x): loose tolerance.
    out_bf16 = dynamic_res_block(x, style_gamma, style_beta, style_omega,
                                 w1, w2, matmul_dtype=jnp.bfloat16)
    out_bf16 = jax.block_until_ready(out_bf16)
    assert jnp.allclose(out_bf16, ref, rtol=1e-1, atol=1e-1), \
        float(jnp.max(jnp.abs(out_bf16 - ref)))

    print("KERNEL_OK")
</pallas_src>

<mosaic_0001>
module attributes {stable_mosaic.version = 11 : i64} {
  func.func @_dyn_resblock_kernel(%arg0: i32, %arg1: memref<1x8x256xf32, #tpu.memory_space<vmem>>, %arg2: memref<1x8x1xf32, #tpu.memory_space<vmem>>, %arg3: memref<1x8x1xf32, #tpu.memory_space<vmem>>, %arg4: memref<1x8x1xf32, #tpu.memory_space<vmem>>, %arg5: memref<8x72xf32, #tpu.memory_space<vmem>>, %arg6: memref<8x72xf32, #tpu.memory_space<vmem>>, %arg7: memref<1x8x256xf32, #tpu.memory_space<vmem>>, %arg8: memref<72x256xf32, #tpu.memory_space<vmem>>) attributes {dimension_semantics = [#tpu.dimension_semantics<parallel>], iteration_bounds = array<i64: 2>, scalar_prefetch = 0 : i64, scratch_operands = 1 : i64, tpu.core_type = #tpu.core_type<tc>, window_params = [{transform_indices = @transform_0, window_bounds = array<i64: 1, 8, 256>}, {transform_indices = @transform_1, window_bounds = array<i64: 1, 8, 1>}, {transform_indices = @transform_2, window_bounds = array<i64: 1, 8, 1>}, {transform_indices = @transform_3, window_bounds = array<i64: 1, 8, 1>}, {pipeline_mode = #tpu.pipeline_mode<synchronous>, transform_indices = @transform_4, window_bounds = array<i64: 8, 72>}, {pipeline_mode = #tpu.pipeline_mode<synchronous>, transform_indices = @transform_5, window_bounds = array<i64: 8, 72>}, {transform_indices = @transform_6, window_bounds = array<i64: 1, 8, 256>}]} {
    %c0 = arith.constant 0 : index
    %c0_0 = arith.constant 0 : index
    %c0_1 = arith.constant 0 : index
    %0 = vector.load %arg1[%c0, %c0_0, %c0_1] : memref<1x8x256xf32, #tpu.memory_space<vmem>>, vector<1x8x256xf32>
    %1 = vector.shape_cast %0 : vector<1x8x256xf32> to vector<8x256xf32>
    %c0_2 = arith.constant 0 : index
    %c0_3 = arith.constant 0 : index
    %c0_4 = arith.constant 0 : index
    %2 = vector.load %arg2[%c0_2, %c0_3, %c0_4] : memref<1x8x1xf32, #tpu.memory_space<vmem>>, vector<1x8x1xf32>
    %3 = vector.shape_cast %2 : vector<1x8x1xf32> to vector<8x1xf32>
    %c0_5 = arith.constant 0 : index
    %c0_6 = arith.constant 0 : index
    %c0_7 = arith.constant 0 : index
    %4 = vector.load %arg3[%c0_5, %c0_6, %c0_7] : memref<1x8x1xf32, #tpu.memory_space<vmem>>, vector<1x8x1xf32>
    %5 = vector.shape_cast %4 : vector<1x8x1xf32> to vector<8x1xf32>
    %c0_8 = arith.constant 0 : index
    %c0_9 = arith.constant 0 : index
    %c0_10 = arith.constant 0 : index
    %6 = vector.load %arg4[%c0_8, %c0_9, %c0_10] : memref<1x8x1xf32, #tpu.memory_space<vmem>>, vector<1x8x1xf32>
    %7 = vector.shape_cast %6 : vector<1x8x1xf32> to vector<8x1xf32>
    %8 = tpu.iota {dimensions = array<i32: 1>} : vector<1x256xi32>
    %c15_i32 = arith.constant 15 : i32
    %9 = vector.broadcast %c15_i32 : i32 to vector<1x256xi32>
    %10 = arith.andi %8, %9 : vector<1x256xi32>
    %c16_i32 = arith.constant 16 : i32
    %11 = vector.broadcast %c16_i32 : i32 to vector<1x256xi32>
    %12 = arith.cmpi slt, %8, %11 : vector<1x256xi32>
    %c240_i32 = arith.constant 240 : i32
    %13 = vector.broadcast %c240_i32 : i32 to vector<1x256xi32>
    %14 = arith.cmpi sge, %8, %13 : vector<1x256xi32>
    %c0_i32 = arith.constant 0 : i32
    %15 = vector.broadcast %c0_i32 : i32 to vector<1x256xi32>
    %16 = arith.cmpi eq, %10, %15 : vector<1x256xi32>
    %c15_i32_11 = arith.constant 15 : i32
    %17 = vector.broadcast %c15_i32_11 : i32 to vector<1x256xi32>
    %18 = arith.cmpi eq, %10, %17 : vector<1x256xi32>
    %c0_12 = arith.constant 0 : index
    %c0_13 = arith.constant 0 : index
    %19 = vector.load %arg5[%c0_12, %c0_13] : memref<8x72xf32, #tpu.memory_space<vmem>>, vector<8x72xf32>
    %20 = vector.shape_cast %12 : vector<1x256xi1> to vector<1x256xi1>
    %21 = vector.broadcast %20 : vector<1x256xi1> to vector<8x256xi1>
    %22 = vector.shape_cast %14 : vector<1x256xi1> to vector<1x256xi1>
    %23 = vector.broadcast %22 : vector<1x256xi1> to vector<8x256xi1>
    %24 = vector.shape_cast %16 : vector<1x256xi1> to vector<1x256xi1>
    %25 = vector.broadcast %24 : vector<1x256xi1> to vector<8x256xi1>
    %26 = vector.shape_cast %18 : vector<1x256xi1> to vector<1x256xi1>
    %27 = vector.broadcast %26 : vector<1x256xi1> to vector<8x256xi1>
    %c240_i32_14 = arith.constant 240 : i32
    %28 = tpu.dynamic_rotate %1 by %c240_i32_14 dim 1 : vector<8x256xf32>, i32 -> vector<8x256xf32>
    %c16_i32_15 = arith.constant 16 : i32
    %29 = tpu.dynamic_rotate %1 by %c16_i32_15 dim 1 : vector<8x256xf32>, i32 -> vector<8x256xf32>
    %30 = arith.select %21, %28, %29 : vector<8x256xi1>, vector<8x256xf32>
    %31 = arith.select %23, %29, %28 : vector<8x256xi1>, vector<8x256xf32>
    %c255_i32 = arith.constant 255 : i32
    %32 = tpu.dynamic_rotate %30 by %c255_i32 dim 1 : vector<8x256xf32>, i32 -> vector<8x256xf32>
    %c1_i32 = arith.constant 1 : i32
    %33 = tpu.dynamic_rotate %30 by %c1_i32 dim 1 : vector<8x256xf32>, i32 -> vector<8x256xf32>
    %34 = arith.select %25, %32, %33 : vector<8x256xi1>, vector<8x256xf32>
    %c0_16 = arith.constant 0 : index
    %c0_17 = arith.constant 0 : index
    %35 = vector.load %arg8[%c0_16, %c0_17] : memref<72x256xf32, #tpu.memory_space<vmem>>, vector<8x256xf32>
    tpu.vector_store %arg8[%c0_16, %c0_17], %34 {strides = array<i32>} : memref<72x256xf32, #tpu.memory_space<vmem>>, vector<8x256xf32>,
    %c8 = arith.constant 8 : index
    %c0_18 = arith.constant 0 : index
    %36 = vector.load %arg8[%c8, %c0_18] : memref<72x256xf32, #tpu.memory_space<vmem>>, vector<8x256xf32>
    tpu.vector_store %arg8[%c8, %c0_18], %30 {strides = array<i32>} : memref<72x256xf32, #tpu.memory_space<vmem>>, vector<8x256xf32>,
    %37 = arith.select %27, %33, %32 : vector<8x256xi1>, vector<8x256xf32>
    %c16 = arith.constant 16 : index
    %c0_19 = arith.constant 0 : index
    %38 = vector.load %arg8[%c16, %c0_19] : memref<72x256xf32, #tpu.memory_space<vmem>>, vector<8x256xf32>
    tpu.vector_store %arg8[%c16, %c0_19], %37 {strides = array<i32>} : memref<72x256xf32, #tpu.memory_space<vmem>>, vector<8x256xf32>,
    %c255_i32_20 = arith.constant 255 : i32
    %39 = tpu.dynamic_rotate %1 by %c255_i32_20 dim 1 : vector<8x256xf32>, i32 -> vector<8x256xf32>
    %c1_i32_21 = arith.constant 1 : i32
    %40 = tpu.dynamic_rotate %1 by %c1_i32_21 dim 1 : vector<8x256xf32>, i32 -> vector<8x256xf32>
    %41 = arith.select %25, %39, %40 : vector<8x256xi1>, vector<8x256xf32>
    %c24 = arith.constant 24 : index
    %c0_22 = arith.constant 0 : index
    %42 = vector.load %arg8[%c24, %c0_22] : memref<72x256xf32, #tpu.memory_space<vmem>>, vector<8x256xf32>
    tpu.vector_store %arg8[%c24, %c0_22], %41 {strides = array<i32>} : memref<72x256xf32, #tpu.memory_space<vmem>>, vector<8x256xf32>,
    %c32 = arith.constant 32 : index
    %c0_23 = arith.constant 0 : index
    %43 = vector.load %arg8[%c32, %c0_23] : memref<72x256xf32, #tpu.memory_space<vmem>>, vector<8x256xf32>
    tpu.vector_store %arg8[%c32, %c0_23], %1 {strides = array<i32>} : memref<72x256xf32, #tpu.memory_space<vmem>>, vector<8x256xf32>,
    %44 = arith.select %27, %40, %39 : vector<8x256xi1>, vector<8x256xf32>
    %c40 = arith.constant 40 : index
    %c0_24 = arith.constant 0 : index
    %45 = vector.load %arg8[%c40, %c0_24] : memref<72x256xf32, #tpu.memory_space<vmem>>, vector<8x256xf32>
    tpu.vector_store %arg8[%c40, %c0_24], %44 {strides = array<i32>} : memref<72x256xf32, #tpu.memory_space<vmem>>, vector<8x256xf32>,
    %c255_i32_25 = arith.constant 255 : i32
    %46 = tpu.dynamic_rotate %31 by %c255_i32_25 dim 1 : vector<8x256xf32>, i32 -> vector<8x256xf32>
    %c1_i32_26 = arith.constant 1 : i32
    %47 = tpu.dynamic_rotate %31 by %c1_i32_26 dim 1 : vector<8x256xf32>, i32 -> vector<8x256xf32>
    %48 = arith.select %25, %46, %47 : vector<8x256xi1>, vector<8x256xf32>
    %c48 = arith.constant 48 : index
    %c0_27 = arith.constant 0 : index
    %49 = vector.load %arg8[%c48, %c0_27] : memref<72x256xf32, #tpu.memory_space<vmem>>, vector<8x256xf32>
    tpu.vector_store %arg8[%c48, %c0_27], %48 {strides = array<i32>} : memref<72x256xf32, #tpu.memory_space<vmem>>, vector<8x256xf32>,
    %c56 = arith.constant 56 : index
    %c0_28 = arith.constant 0 : index
    %50 = vector.load %arg8[%c56, %c0_28] : memref<72x256xf32, #tpu.memory_space<vmem>>, vector<8x256xf32>
    tpu.vector_store %arg8[%c56, %c0_28], %31 {strides = array<i32>} : memref<72x256xf32, #tpu.memory_space<vmem>>, vector<8x256xf32>,
    %51 = arith.select %27, %47, %46 : vector<8x256xi1>, vector<8x256xf32>
    %c64 = arith.constant 64 : index
    %c0_29 = arith.constant 0 : index
    %52 = vector.load %arg8[%c64, %c0_29] : memref<72x256xf32, #tpu.memory_space<vmem>>, vector<8x256xf32>
    tpu.vector_store %arg8[%c64, %c0_29], %51 {strides = array<i32>} : memref<72x256xf32, #tpu.memory_space<vmem>>, vector<8x256xf32>,
    %c0_30 = arith.constant 0 : index
    %c0_31 = arith.constant 0 : index
    %53 = vector.load %arg8[%c0_30, %c0_31] : memref<72x256xf32, #tpu.memory_space<vmem>>, vector<72x256xf32>
    %cst = arith.constant dense<0.000000e+00> : vector<8x256xf32>
    %54 = tpu.matmul %19, %53, %cst {dimension_numbers = #tpu.dot_dimension_numbers<[1], [0], [0], [1], [0, 0, 1, 1], [], []>} : vector<8x72xf32>, vector<72x256xf32>, vector<8x256xf32> -> vector<8x256xf32>
    %cst_32 = arith.constant dense<0.000000e+00> : vector<8xf32>
    %55 = vector.multi_reduction <add>, %54, %cst_32 [1] : vector<8x256xf32> to vector<8xf32>
    %56 = vector.shape_cast %55 : vector<8xf32> to vector<8x1xf32>
    %cst_33 = arith.constant 3.906250e-03 : f32
    %57 = vector.broadcast %cst_33 : f32 to vector<8x1xf32>
    %58 = arith.mulf %56, %57 : vector<8x1xf32>
    %59 = vector.broadcast %58 : vector<8x1xf32> to vector<8x256xf32>
    %60 = arith.subf %54, %59 : vector<8x256xf32>
    %61 = arith.mulf %60, %60 : vector<8x256xf32>
    %cst_34 = arith.constant dense<0.000000e+00> : vector<8xf32>
    %62 = vector.multi_reduction <add>, %61, %cst_34 [1] : vector<8x256xf32> to vector<8xf32>
    %63 = vector.shape_cast %62 : vector<8xf32> to vector<8x1xf32>
    %cst_35 = arith.constant 0.00392156886 : f32
    %64 = vector.broadcast %cst_35 : f32 to vector<8x1xf32>
    %65 = arith.mulf %63, %64 : vector<8x1xf32>
    %cst_36 = arith.constant dense<0.000000e+00> : vector<1xf32>
    %66 = vector.multi_reduction <add>, %56, %cst_36 [0] : vector<8x1xf32> to vector<1xf32>
    %67 = vector.shape_cast %66 : vector<1xf32> to vector<1x1xf32>
    %cst_37 = arith.constant 4.8828125E-4 : f32
    %68 = vector.broadcast %cst_37 : f32 to vector<1x1xf32>
    %69 = arith.mulf %67, %68 : vector<1x1xf32>
    %70 = vector.broadcast %69 : vector<1x1xf32> to vector<8x1xf32>
    %71 = arith.subf %58, %70 : vector<8x1xf32>
    %cst_38 = arith.constant 2.560000e+02 : f32
    %72 = vector.broadcast %cst_38 : f32 to vector<8x1xf32>
    %73 = arith.mulf %72, %71 : vector<8x1xf32>
    %74 = arith.mulf %73, %71 : vector<8x1xf32>
    %75 = arith.addf %63, %74 : vector<8x1xf32>
    %cst_39 = arith.constant dense<0.000000e+00> : vector<1xf32>
    %76 = vector.multi_reduction <add>, %75, %cst_39 [0] : vector<8x1xf32> to vector<1xf32>
    %77 = vector.shape_cast %76 : vector<1xf32> to vector<1x1xf32>
    %cst_40 = arith.constant 4.88519785E-4 : f32
    %78 = vector.broadcast %cst_40 : f32 to vector<1x1xf32>
    %79 = arith.mulf %77, %78 : vector<1x1xf32>
    %cst_41 = arith.constant 9.99999974E-6 : f32
    %80 = vector.broadcast %cst_41 : f32 to vector<8x1xf32>
    %81 = arith.addf %65, %80 : vector<8x1xf32>
    %82 = math.rsqrt %81 : vector<8x1xf32>
    %cst_42 = arith.constant 9.99999974E-6 : f32
    %83 = vector.broadcast %cst_42 : f32 to vector<1x1xf32>
    %84 = arith.addf %79, %83 : vector<1x1xf32>
    %85 = math.rsqrt %84 : vector<1x1xf32>
    %86 = arith.mulf %7, %82 : vector<8x1xf32>
    %cst_43 = arith.constant 1.000000e+00 : f32
    %87 = vector.broadcast %cst_43 : f32 to vector<8x1xf32>
    %88 = arith.subf %87, %7 : vector<8x1xf32>
    %89 = vector.broadcast %85 : vector<1x1xf32> to vector<8x1xf32>
    %90 = arith.mulf %88, %89 : vector<8x1xf32>
    %91 = arith.addf %86, %90 : vector<8x1xf32>
    %92 = arith.mulf %7, %58 : vector<8x1xf32>
    %93 = arith.mulf %92, %82 : vector<8x1xf32>
    %cst_44 = arith.constant 1.000000e+00 : f32
    %94 = vector.broadcast %cst_44 : f32 to vector<8x1xf32>
    %95 = arith.subf %94, %7 : vector<8x1xf32>
    %96 = vector.broadcast %69 : vector<1x1xf32> to vector<8x1xf32>
    %97 = arith.mulf %95, %96 : vector<8x1xf32>
    %98 = vector.broadcast %85 : vector<1x1xf32> to vector<8x1xf32>
    %99 = arith.mulf %97, %98 : vector<8x1xf32>
    %100 = arith.addf %93, %99 : vector<8x1xf32>
    %101 = arith.mulf %3, %91 : vector<8x1xf32>
    %102 = arith.mulf %3, %100 : vector<8x1xf32>
    %103 = arith.subf %5, %102 : vector<8x1xf32>
    %104 = vector.broadcast %101 : vector<8x1xf32> to vector<8x256xf32>
    %105 = arith.mulf %54, %104 : vector<8x256xf32>
    %106 = vector.broadcast %103 : vector<8x1xf32> to vector<8x256xf32>
    %107 = arith.addf %105, %106 : vector<8x256xf32>
    %cst_45 = arith.constant 0.000000e+00 : f32
    %108 = vector.broadcast %cst_45 : f32 to vector<8x256xf32>
    %109 = arith.maximumf %107, %108 : vector<8x256xf32>
    %c0_46 = arith.constant 0 : index
    %c0_47 = arith.constant 0 : index
    %110 = vector.load %arg6[%c0_46, %c0_47] : memref<8x72xf32, #tpu.memory_space<vmem>>, vector<8x72xf32>
    %111 = vector.shape_cast %12 : vector<1x256xi1> to vector<1x256xi1>
    %112 = vector.broadcast %111 : vector<1x256xi1> to vector<8x256xi1>
    %113 = vector.shape_cast %14 : vector<1x256xi1> to vector<1x256xi1>
    %114 = vector.broadcast %113 : vector<1x256xi1> to vector<8x256xi1>
    %115 = vector.shape_cast %16 : vector<1x256xi1> to vector<1x256xi1>
    %116 = vector.broadcast %115 : vector<1x256xi1> to vector<8x256xi1>
    %117 = vector.shape_cast %18 : vector<1x256xi1> to vector<1x256xi1>
    %118 = vector.broadcast %117 : vector<1x256xi1> to vector<8x256xi1>
    %c240_i32_48 = arith.constant 240 : i32
    %119 = tpu.dynamic_rotate %109 by %c240_i32_48 dim 1 : vector<8x256xf32>, i32 -> vector<8x256xf32>
    %c16_i32_49 = arith.constant 16 : i32
    %120 = tpu.dynamic_rotate %109 by %c16_i32_49 dim 1 : vector<8x256xf32>, i32 -> vector<8x256xf32>
    %121 = arith.select %112, %119, %120 : vector<8x256xi1>, vector<8x256xf32>
    %122 = arith.select %114, %120, %119 : vector<8x256xi1>, vector<8x256xf32>
    %c255_i32_50 = arith.constant 255 : i32
    %123 = tpu.dynamic_rotate %121 by %c255_i32_50 dim 1 : vector<8x256xf32>, i32 -> vector<8x256xf32>
    %c1_i32_51 = arith.constant 1 : i32
    %124 = tpu.dynamic_rotate %121 by %c1_i32_51 dim 1 : vector<8x256xf32>, i32 -> vector<8x256xf32>
    %125 = arith.select %116, %123, %124 : vector<8x256xi1>, vector<8x256xf32>
    %c0_52 = arith.constant 0 : index
    %c0_53 = arith.constant 0 : index
    %126 = vector.load %arg8[%c0_52, %c0_53] : memref<72x256xf32, #tpu.memory_space<vmem>>, vector<8x256xf32>
    tpu.vector_store %arg8[%c0_52, %c0_53], %125 {strides = array<i32>} : memref<72x256xf32, #tpu.memory_space<vmem>>, vector<8x256xf32>,
    %c8_54 = arith.constant 8 : index
    %c0_55 = arith.constant 0 : index
    %127 = vector.load %arg8[%c8_54, %c0_55] : memref<72x256xf32, #tpu.memory_space<vmem>>, vector<8x256xf32>
    tpu.vector_store %arg8[%c8_54, %c0_55], %121 {strides = array<i32>} : memref<72x256xf32, #tpu.memory_space<vmem>>, vector<8x256xf32>,
    %128 = arith.select %118, %124, %123 : vector<8x256xi1>, vector<8x256xf32>
    %c16_56 = arith.constant 16 : index
    %c0_57 = arith.constant 0 : index
    %129 = vector.load %arg8[%c16_56, %c0_57] : memref<72x256xf32, #tpu.memory_space<vmem>>, vector<8x256xf32>
    tpu.vector_store %arg8[%c16_56, %c0_57], %128 {strides = array<i32>} : memref<72x256xf32, #tpu.memory_space<vmem>>, vector<8x256xf32>,
    %c255_i32_58 = arith.constant 255 : i32
    %130 = tpu.dynamic_rotate %109 by %c255_i32_58 dim 1 : vector<8x256xf32>, i32 -> vector<8x256xf32>
    %c1_i32_59 = arith.constant 1 : i32
    %131 = tpu.dynamic_rotate %109 by %c1_i32_59 dim 1 : vector<8x256xf32>, i32 -> vector<8x256xf32>
    %132 = arith.select %116, %130, %131 : vector<8x256xi1>, vector<8x256xf32>
    %c24_60 = arith.constant 24 : index
    %c0_61 = arith.constant 0 : index
    %133 = vector.load %arg8[%c24_60, %c0_61] : memref<72x256xf32, #tpu.memory_space<vmem>>, vector<8x256xf32>
    tpu.vector_store %arg8[%c24_60, %c0_61], %132 {strides = array<i32>} : memref<72x256xf32, #tpu.memory_space<vmem>>, vector<8x256xf32>,
    %c32_62 = arith.constant 32 : index
    %c0_63 = arith.constant 0 : index
    %134 = vector.load %arg8[%c32_62, %c0_63] : memref<72x256xf32, #tpu.memory_space<vmem>>, vector<8x256xf32>
    tpu.vector_store %arg8[%c32_62, %c0_63], %109 {strides = array<i32>} : memref<72x256xf32, #tpu.memory_space<vmem>>, vector<8x256xf32>,
    %135 = arith.select %118, %131, %130 : vector<8x256xi1>, vector<8x256xf32>
    %c40_64 = arith.constant 40 : index
    %c0_65 = arith.constant 0 : index
    %136 = vector.load %arg8[%c40_64, %c0_65] : memref<72x256xf32, #tpu.memory_space<vmem>>, vector<8x256xf32>
    tpu.vector_store %arg8[%c40_64, %c0_65], %135 {strides = array<i32>} : memref<72x256xf32, #tpu.memory_space<vmem>>, vector<8x256xf32>,
    %c255_i32_66 = arith.constant 255 : i32
    %137 = tpu.dynamic_rotate %122 by %c255_i32_66 dim 1 : vector<8x256xf32>, i32 -> vector<8x256xf32>
    %c1_i32_67 = arith.constant 1 : i32
    %138 = tpu.dynamic_rotate %122 by %c1_i32_67 dim 1 : vector<8x256xf32>, i32 -> vector<8x256xf32>
    %139 = arith.select %116, %137, %138 : vector<8x256xi1>, vector<8x256xf32>
    %c48_68 = arith.constant 48 : index
    %c0_69 = arith.constant 0 : index
    %140 = vector.load %arg8[%c48_68, %c0_69] : memref<72x256xf32, #tpu.memory_space<vmem>>, vector<8x256xf32>
    tpu.vector_store %arg8[%c48_68, %c0_69], %139 {strides = array<i32>} : memref<72x256xf32, #tpu.memory_space<vmem>>, vector<8x256xf32>,
    %c56_70 = arith.constant 56 : index
    %c0_71 = arith.constant 0 : index
    %141 = vector.load %arg8[%c56_70, %c0_71] : memref<72x256xf32, #tpu.memory_space<vmem>>, vector<8x256xf32>
    tpu.vector_store %arg8[%c56_70, %c0_71], %122 {strides = array<i32>} : memref<72x256xf32, #tpu.memory_space<vmem>>, vector<8x256xf32>,
    %142 = arith.select %118, %138, %137 : vector<8x256xi1>, vector<8x256xf32>
    %c64_72 = arith.constant 64 : index
    %c0_73 = arith.constant 0 : index
    %143 = vector.load %arg8[%c64_72, %c0_73] : memref<72x256xf32, #tpu.memory_space<vmem>>, vector<8x256xf32>
    tpu.vector_store %arg8[%c64_72, %c0_73], %142 {strides = array<i32>} : memref<72x256xf32, #tpu.memory_space<vmem>>, vector<8x256xf32>,
    %c0_74 = arith.constant 0 : index
    %c0_75 = arith.constant 0 : index
    %144 = vector.load %arg8[%c0_74, %c0_75] : memref<72x256xf32, #tpu.memory_space<vmem>>, vector<72x256xf32>
    %cst_76 = arith.constant dense<0.000000e+00> : vector<8x256xf32>
    %145 = tpu.matmul %110, %144, %cst_76 {dimension_numbers = #tpu.dot_dimension_numbers<[1], [0], [0], [1], [0, 0, 1, 1], [], []>} : vector<8x72xf32>, vector<72x256xf32>, vector<8x256xf32> -> vector<8x256xf32>
    %cst_77 = arith.constant dense<0.000000e+00> : vector<8xf32>
    %146 = vector.multi_reduction <add>, %145, %cst_77 [1] : vector<8x256xf32> to vector<8xf32>
    %147 = vector.shape_cast %146 : vector<8xf32> to vector<8x1xf32>
    %cst_78 = arith.constant 3.906250e-03 : f32
    %148 = vector.broadcast %cst_78 : f32 to vector<8x1xf32>
    %149 = arith.mulf %147, %148 : vector<8x1xf32>
    %150 = vector.broadcast %149 : vector<8x1xf32> to vector<8x256xf32>
    %151 = arith.subf %145, %150 : vector<8x256xf32>
    %152 = arith.mulf %151, %151 : vector<8x256xf32>
    %cst_79 = arith.constant dense<0.000000e+00> : vector<8xf32>
    %153 = vector.multi_reduction <add>, %152, %cst_79 [1] : vector<8x256xf32> to vector<8xf32>
    %154 = vector.shape_cast %153 : vector<8xf32> to vector<8x1xf32>
    %cst_80 = arith.constant 0.00392156886 : f32
    %155 = vector.broadcast %cst_80 : f32 to vector<8x1xf32>
    %156 = arith.mulf %154, %155 : vector<8x1xf32>
    %cst_81 = arith.constant dense<0.000000e+00> : vector<1xf32>
    %157 = vector.multi_reduction <add>, %147, %cst_81 [0] : vector<8x1xf32> to vector<1xf32>
    %158 = vector.shape_cast %157 : vector<1xf32> to vector<1x1xf32>
    %cst_82 = arith.constant 4.8828125E-4 : f32
    %159 = vector.broadcast %cst_82 : f32 to vector<1x1xf32>
    %160 = arith.mulf %158, %159 : vector<1x1xf32>
    %161 = vector.broadcast %160 : vector<1x1xf32> to vector<8x1xf32>
    %162 = arith.subf %149, %161 : vector<8x1xf32>
    %cst_83 = arith.constant 2.560000e+02 : f32
    %163 = vector.broadcast %cst_83 : f32 to vector<8x1xf32>
    %164 = arith.mulf %163, %162 : vector<8x1xf32>
    %165 = arith.mulf %164, %162 : vector<8x1xf32>
    %166 = arith.addf %154, %165 : vector<8x1xf32>
    %cst_84 = arith.constant dense<0.000000e+00> : vector<1xf32>
    %167 = vector.multi_reduction <add>, %166, %cst_84 [0] : vector<8x1xf32> to vector<1xf32>
    %168 = vector.shape_cast %167 : vector<1xf32> to vector<1x1xf32>
    %cst_85 = arith.constant 4.88519785E-4 : f32
    %169 = vector.broadcast %cst_85 : f32 to vector<1x1xf32>
    %170 = arith.mulf %168, %169 : vector<1x1xf32>
    %cst_86 = arith.constant 9.99999974E-6 : f32
    %171 = vector.broadcast %cst_86 : f32 to vector<8x1xf32>
    %172 = arith.addf %156, %171 : vector<8x1xf32>
    %173 = math.rsqrt %172 : vector<8x1xf32>
    %cst_87 = arith.constant 9.99999974E-6 : f32
    %174 = vector.broadcast %cst_87 : f32 to vector<1x1xf32>
    %175 = arith.addf %170, %174 : vector<1x1xf32>
    %176 = math.rsqrt %175 : vector<1x1xf32>
    %177 = arith.mulf %7, %173 : vector<8x1xf32>
    %cst_88 = arith.constant 1.000000e+00 : f32
    %178 = vector.broadcast %cst_88 : f32 to vector<8x1xf32>
    %179 = arith.subf %178, %7 : vector<8x1xf32>
    %180 = vector.broadcast %176 : vector<1x1xf32> to vector<8x1xf32>
    %181 = arith.mulf %179, %180 : vector<8x1xf32>
    %182 = arith.addf %177, %181 : vector<8x1xf32>
    %183 = arith.mulf %7, %149 : vector<8x1xf32>
    %184 = arith.mulf %183, %173 : vector<8x1xf32>
    %cst_89 = arith.constant 1.000000e+00 : f32
    %185 = vector.broadcast %cst_89 : f32 to vector<8x1xf32>
    %186 = arith.subf %185, %7 : vector<8x1xf32>
    %187 = vector.broadcast %160 : vector<1x1xf32> to vector<8x1xf32>
    %188 = arith.mulf %186, %187 : vector<8x1xf32>
    %189 = vector.broadcast %176 : vector<1x1xf32> to vector<8x1xf32>
    %190 = arith.mulf %188, %189 : vector<8x1xf32>
    %191 = arith.addf %184, %190 : vector<8x1xf32>
    %192 = arith.mulf %3, %182 : vector<8x1xf32>
    %193 = arith.mulf %3, %191 : vector<8x1xf32>
    %194 = arith.subf %5, %193 : vector<8x1xf32>
    %195 = vector.broadcast %192 : vector<8x1xf32> to vector<8x256xf32>
    %196 = arith.mulf %145, %195 : vector<8x256xf32>
    %197 = vector.broadcast %194 : vector<8x1xf32> to vector<8x256xf32>
    %198 = arith.addf %196, %197 : vector<8x256xf32>
    %199 = arith.addf %198, %1 : vector<8x256xf32>
    %c0_90 = arith.constant 0 : index
    %c0_91 = arith.constant 0 : index
    %c0_92 = arith.constant 0 : index
    %200 = vector.load %arg7[%c0_90, %c0_91, %c0_92] : memref<1x8x256xf32, #tpu.memory_space<vmem>>, vector<1x8x256xf32>
    %201 = vector.shape_cast %200 : vector<1x8x256xf32> to vector<8x256xf32>
    %202 = vector.shape_cast %199 : vector<8x256xf32> to vector<1x8x256xf32>
    tpu.vector_store %arg7[%c0_90, %c0_91, %c0_92], %202 {strides = array<i32>} : memref<1x8x256xf32, #tpu.memory_space<vmem>>, vector<1x8x256xf32>,
    return
  }
  func.func @transform_0(%arg0: i32) -> (i32, i32, i32) {
    %c0_i32 = arith.constant 0 : i32
    %c0_i32_0 = arith.constant 0 : i32
    %c0_i32_1 = arith.constant 0 : i32
    return %arg0, %c0_i32, %c0_i32_0 : i32, i32, i32
  }
  func.func @transform_1(%arg0: i32) -> (i32, i32, i32) {
    %c0_i32 = arith.constant 0 : i32
    %c0_i32_0 = arith.constant 0 : i32
    %c0_i32_1 = arith.constant 0 : i32
    return %arg0, %c0_i32, %c0_i32_0 : i32, i32, i32
  }
  func.func @transform_2(%arg0: i32) -> (i32, i32, i32) {
    %c0_i32 = arith.constant 0 : i32
    %c0_i32_0 = arith.constant 0 : i32
    %c0_i32_1 = arith.constant 0 : i32
    return %arg0, %c0_i32, %c0_i32_0 : i32, i32, i32
  }
  func.func @transform_3(%arg0: i32) -> (i32, i32, i32) {
    %c0_i32 = arith.constant 0 : i32
    %c0_i32_0 = arith.constant 0 : i32
    %c0_i32_1 = arith.constant 0 : i32
    return %arg0, %c0_i32, %c0_i32_0 : i32, i32, i32
  }
  func.func @transform_4(%arg0: i32) -> (i32, i32) {
    %c0_i32 = arith.constant 0 : i32
    %c0_i32_0 = arith.constant 0 : i32
    %c0_i32_1 = arith.constant 0 : i32
    return %c0_i32, %c0_i32_0 : i32, i32
  }
  func.func @transform_5(%arg0: i32) -> (i32, i32) {
    %c0_i32 = arith.constant 0 : i32
    %c0_i32_0 = arith.constant 0 : i32
    %c0_i32_1 = arith.constant 0 : i32
    return %c0_i32, %c0_i32_0 : i32, i32
  }
  func.func @transform_6(%arg0: i32) -> (i32, i32, i32) {
    %c0_i32 = arith.constant 0 : i32
    %c0_i32_0 = arith.constant 0 : i32
    %c0_i32_1 = arith.constant 0 : i32
    return %arg0, %c0_i32, %c0_i32_0 : i32, i32, i32
  }
}

</mosaic_0001>

<bundles_post_ra>
// kernel: tpu_custom_call.1
= control target key start
LH: loop header
LB: loop body
LE: loop exit
PB: predicated region body
PF: predicated region fallthrough
CT: control target
= control target key end

     0   :  { %11 = vsyncpa [#allocation4], 0  ;;  %s1539_s0 = inlined_call_operand.vmem [shape: f32[2,8,256], index: 0, kind: input, shape index: {}]   ;;  %s1540_s1 = inlined_call_operand.vmem [shape: f32[2,8,1], index: 1, kind: input, shape index: {}]   ;;  %s1541_s2 = inlined_call_operand.vmem [shape: f32[2,8,1], index: 2, kind: input, shape index: {}]   ;;  %s1542_s3 = inlined_call_operand.vmem [shape: f32[2,8,1], index: 3, kind: input, shape index: {}]   ;;  %s1543_s4 = inlined_call_operand.vmem [shape: f32[8,72], index: 4, kind: input, shape index: {}]   ;;  %s1544_s5 = inlined_call_operand.vmem [shape: f32[8,72], index: 5, kind: input, shape index: {}]   ;;  %s1545_s6 = inlined_call_operand.hbm [shape: f32[2,8,256], index: 6, kind: output, shape index: {}]  }
   0x1   :  { %13 = vsyncpa [#allocation4 + $0x1], 0  ;;  %s1176_s21 = smov 0   ;;  %s1178_s22 = smov 0  }
   0x2   :  { %s1180_s23 = smov 0   ;;  %s1182_s24 = smov 0  }
   0x3 LB: > { %s1197_s25 = sadd.s32 4294967295, %s1132_s24   ;;  %s924_s26 = sadd.s32 4294967294, %s1132_s24   ;;  %s1132_s24 = sphi %s1182_s24, %s1559_s24   ;;  %s1128_s23 = sphi %s1180_s23, %s1558_s23   ;;  %s1124_s22 = sphi %s1178_s22, %s1557_s22   ;;  %s1120_s21 = sphi %s1176_s21, %s1556_s21  }
   0x4   : > { %s1201_s27 = sadd.s32 1, %s1132_s24   ;;  %s172_s28 = sadd.s32 1, %s1128_s23 }
   0x5   : > { %s169_s29 = ssub.s32 %s1132_s24, %s1201_s27  ;;  %p182_p0 = scmp.ne.s32.totalorder %s1128_s23, %s1124_s22 }
   0x6   : > { %p170_p1 = scmp.eq.s32.totalorder %s169_s29, 0  ;;  %p183_p2 = scmp.eq.s32.totalorder %s1197_s25, 1 }
   0x7   : > { %p188_p3 = scmp.ne.s32.totalorder %s1124_s22, %s1120_s21  ;;  %p189_p4 = scmp.eq.s32.totalorder %s924_s26, 1 }
   0x8   : > { %s1212_s30 = scalar_select %p170_p1, %s1128_s23, %s172_s28  }
   0x9   : > { %p1214_p5 = por %p183_p2, %p182_p0  ;;  %p1218_p6 = por %p189_p4, %p188_p3 }
   0xa   : > { %p927_p7 = scmp.ge.s32.totalorder %s1132_s24, 1  ;;  %p242_p8 = scmp.lt.s32.totalorder %s1132_s24, 3 }
   0xc   : > { %p243_p9 = pnand %p927_p7, %p242_p8 }
   0xd   : > { %p284_p10 = scmp.lt.s32.totalorder (!%p243_p9), %s1197_s25, 1  ;;  %s1134_s14 = smov (!%p243_p9), 16   ;;  %v306_v2 = vlaneseq (!%p243_p9)  ;;  %v1138_v17 = vmov (!%p243_p9), 0.0   ;;  %vm439_vm9 = vcmask (!%p243_p9), 588800  }
   0xe   : > { %246 = sbr.rel (%p243_p9) target bundleno = 1929 (0x789), region = 44  ;;  %s1135_s15 = smov (!%p243_p9), 112   ;;  %507 = vmatprep.mubr.f32.mxu0 (!%p243_p9), %v1138_v17  ;;  %744 = vmatprep.mubr.f32.mxu1 (!%p243_p9), %v1138_v17 }
   0xf   : > { %v1244_v3 = vand.u32 (!%p243_p9), 127, %v306_v2  ;;  %s1136_s16 = smov (!%p243_p9), 1   ;;  %s1137_s17 = smov (!%p243_p9), 127  }
  0x10   : > { %s942_s19 = sshll.u32 (!%p243_p9), %s1197_s25, 8 }
  0x11   : > { %vm311_vm0 = vcmp.lt.s32.totalorder (!%p243_p9), %v1244_v3, 16  ;;  %vm340_vm1 = vcmp.lt.s32.totalorder (!%p243_p9), %v1244_v3, 112  ;;  %v1264_v14 = vadd.s32 (!%p243_p9), 128, %v1244_v3  ;;  %v309_v19 = vand.u32 (!%p243_p9), 15, %v1244_v3 }
  0x12   : > { %vm364_vm3 = vcmp.lt.s32.totalorder (!%p243_p9), %v1244_v3, 1  ;;  %vm357_vm4 = vcmp.lt.s32.totalorder (!%p243_p9), %v1244_v3, 127  ;;  %v576_v3 = vld [vmem:[%s1544_s5] sm:$0xff] (!%p243_p9) }
  0x13   : > { %vm314_vm2 = vcmp.ge.s32.totalorder (!%p243_p9), %v1264_v14, 240  ;;  %v310_v18 = vand.u32 (!%p243_p9), 15, %v1264_v14  ;;  %vm1291_vm6 = vcmp.eq.s32.totalorder (!%p243_p9), %v309_v19, 0  ;;  %vm1311_vm8 = vcmp.eq.s32.totalorder (!%p243_p9), %v309_v19, 15 }
  0x15   : > { %s1226_s9 = scalar_select %p284_p10, %s1197_s25, 1  ;;  %vm1287_vm5 = vcmp.eq.s32.totalorder %v310_v18, 0  ;;  %vm1303_vm7 = vcmp.eq.s32.totalorder %v310_v18, 15 }
  0x17   : > { %s941_s10 = sshll.u32 %s1226_s9, 4  ;;  %s931_s20 = sshll.u32 %s1226_s9, 3 }
  0x18   : > { %s288_s13 = scalar_lea.vmem %s1539_s0, %s941_s10  ;;  %s300_s29 = scalar_lea.vmem %s1542_s3, %s931_s20 }
  0x19   : > { %v1232_v0 = vld [vmem:[%s288_s13] sm:$0xff]  ;;  %v1238_v1 = vld [vmem:[%s288_s13 + $0x8] sm:$0xff]  ;;  %s292_s12 = scalar_lea.vmem %s1540_s1, %s931_s20  ;;  %s296_s18 = scalar_lea.vmem %s1541_s2, %s931_s20 }
  0x1a   : > { %343 = vrot.lane.b32.xlu1 %v1232_v0, %s1134_s14  ;;  %336 = vrot.lane.b32.xlu0 %v1232_v0, %s1135_s15  ;;  %v1035_v13 = vpack.i.bf16 %v1238_v1, %v1232_v0  ;;  %s1497_s10 = scalar_lea.hbm %s1545_s6, %s942_s19 }
  0x1e   : > { %345 = vrot.lane.b32.xlu1 %v1238_v1, %s1134_s14  ;;  %338 = vrot.lane.b32.xlu0 %v1238_v1, %s1135_s15 }
  0x8c   : > { %v344_v4 = vpop.permute.xlu1 %343  ;;  %v337_v5 = vpop.permute.xlu0 %336 }
  0x90   : > { %v346_v6 = vpop.permute.xlu1 %345  ;;  %v339_v7 = vpop.permute.xlu0 %338 }
  0x91   : > { %v347_v8 = vsel %vm311_vm0, %v344_v4, %v346_v6  ;;  %v348_v9 = vsel %vm311_vm0, %v346_v6, %v344_v4  ;;  %v1254_v10 = vsel %vm340_vm1, %v337_v5, %v339_v7  ;;  %v342_v15 = vsel %vm340_vm1, %v339_v7, %v337_v5 }
  0x92   : > { %v349_v11 = vsel %vm311_vm0, %v1254_v10, %v348_v9  ;;  %v1273_v16 = vsel %vm314_vm2, %v347_v8, %v342_v15 }
  0x93   : > { %v1030_v12 = vpack.i.bf16 %v347_v8, %v349_v11 }
  0x95   : > { %1031 = vrot.lane.b32.xlu1 %v1030_v12, %s1136_s16  ;;  %1021 = vrot.lane.b32.xlu0 %v1030_v12, %s1137_s17 }
  0x99   : > { %1036 = vrot.lane.b32.xlu1 %v1035_v13, %s1136_s16  ;;  %1026 = vrot.lane.b32.xlu0 %v1035_v13, %s1137_s17 }
  0x9d   : > { %401 = vrot.lane.b32.xlu1 %v1273_v16, %s1137_s17  ;;  %399 = vrot.lane.b32.xlu0 %v1254_v10, %s1137_s17 }
  0xa1   : > { %407 = vrot.lane.b32.xlu1 %v1273_v16, %s1136_s16  ;;  %405 = vrot.lane.b32.xlu0 %v1254_v10, %s1136_s16 }
 0x107   : > { %v1032_v20 = vpop.permute.xlu1 %1031  ;;  %v1022_v21 = vpop.permute.xlu0 %1021 }
 0x108   : > { %v1034_v24 = vunpack.i.h.bf16 %v1032_v20  ;;  %v1033_v25 = vunpack.i.l.bf16 %v1032_v20  ;;  %v1024_v26 = vunpack.i.h.bf16 %v1022_v21  ;;  %v1023_v27 = vunpack.i.l.bf16 %v1022_v21 }
 0x10a   : > { %v359_v28 = vsel %vm357_vm4, %v1024_v26, %v1023_v27  ;;  %v365_v29 = vsel %vm364_vm3, %v1033_v25, %v1034_v24  ;;  %v358_v30 = vsel %vm357_vm4, %v1023_v27, %v1024_v26  ;;  %v366_v31 = vsel %vm364_vm3, %v1034_v24, %v1033_v25 }
 0x10b   : > { %v1037_v33 = vpop.permute.xlu1 %1036  ;;  %v1027_v34 = vpop.permute.xlu0 %1026  ;;  %v368_v35 = vsel %vm1287_vm5, %v359_v28, %v365_v29  ;;  %v367_v36 = vsel %vm1291_vm6, %v358_v30, %v366_v31  ;;  %v374_v50 = vsel %vm1303_vm7, %v365_v29, %v359_v28  ;;  %v373_v52 = vsel %vm1311_vm8, %v366_v31, %v358_v30 }
 0x10c   : > { %v1039_v38 = vunpack.i.h.bf16 %v1037_v33  ;;  %v1038_v39 = vunpack.i.l.bf16 %v1037_v33  ;;  %v1029_v40 = vunpack.i.h.bf16 %v1027_v34  ;;  %v1028_v41 = vunpack.i.l.bf16 %v1027_v34 }
 0x10d   : > { %v943_v42 = vpack.c.bf16 %v347_v8, %v368_v35  ;;  %v945_v43 = vpack.c.bf16 %v349_v11, %v367_v36  ;;  %v319_v11 = vld [vmem:[%s1543_s4] sm:$0xff]  ;;  %v1139_v25 = vmov 0  }
 0x10e   : > { %v387_v44 = vsel %vm364_vm3, %v1038_v39, %v1039_v38  ;;  %v388_v45 = vsel %vm364_vm3, %v1039_v38, %v1038_v39  ;;  %v381_v46 = vsel %vm357_vm4, %v1028_v41, %v1029_v40  ;;  %v382_v47 = vsel %vm357_vm4, %v1029_v40, %v1028_v41  ;;  %1040 = vset.pattern.permute.xlu0 %v1139_v25 }
 0x10f   : > { %944 = vmatprep.subr.bf16.mxu0 %v943_v42  ;;  %v402_v48 = vpop.permute.xlu1 %401  ;;  %v400_v49 = vpop.permute.xlu0 %399  ;;  %v390_v51 = vsel %vm1287_vm5, %v382_v47, %v387_v44  ;;  %v389_v53 = vsel %vm1291_vm6, %v381_v46, %v388_v45  ;;  %v396_v56 = vsel %vm1303_vm7, %v387_v44, %v382_v47  ;;  %v395_v60 = vsel %vm1311_vm8, %v388_v45, %v381_v46 }
 0x110   : > { %946 = vmatpush1.bf16.msra.mxu0 %v945_v43  ;;  %v947_v54 = vpack.c.bf16 %v390_v51, %v374_v50  ;;  %v949_v55 = vpack.c.bf16 %v389_v53, %v373_v52  ;;  %v951_v59 = vpack.c.bf16 %v396_v56, %v1238_v1  ;;  %v404_v61 = vsel %vm357_vm4, %v402_v48, %v400_v49  ;;  %v1371_v50 = vld [vmem:[%s300_s29] sm:$0xff] }
 0x111   : > { %v403_v4 = vsel %vm357_vm4, %v400_v49, %v402_v48  ;;  %v953_v5 = vpack.c.bf16 %v395_v60, %v1232_v0  ;;  %1041 = vset.pattern.permute.xlu1 %v1139_v25  ;;  %v1374_v51 = vsub.f32 1.0, %v1371_v50  ;;  %v1386_v60 = vld [vmem:[%s292_s12] sm:$0xff]  ;;  %s1140_s12 = smov [#allocation3]  }
 0x112   : > { %948 = vmatprep.subr.bf16.mxu0 %v947_v54  ;;  %s1074_s9 = sshll.u32 %s1140_s12, 4  ;;  %s1075_s9 = int_to_ptr.vmem [resolvable:$false] %s1074_s9 }
 0x113   : > { %v408_v57 = vpop.permute.xlu1 %407  ;;  %v406_v58 = vpop.permute.xlu0 %405  ;;  %s1076_s13 = scalar_lea.vmem %s1075_s9, 512 }
 0x114   : > { %v409_v62 = vsel %vm364_vm3, %v406_v58, %v408_v57  ;;  %v410_v63 = vsel %vm364_vm3, %v408_v57, %v406_v58  ;;  %950 = vmatpush1.bf16.msra.mxu0 %v949_v55 }
 0x115   : > { %v412_v2 = vsel %vm1287_vm5, %v404_v61, %v409_v62  ;;  %952 = vmatprep.subr.bf16.mxu0 %v951_v59  ;;  %v411_v7 = vsel %vm1291_vm6, %v403_v4, %v410_v63  ;;  %v418_v9 = vsel %vm1303_vm7, %v409_v62, %v404_v61  ;;  %v417_v12 = vsel %vm1311_vm8, %v410_v63, %v403_v4  ;;  %v1388_v63 = vld [vmem:[%s296_s18] sm:$0xff] }
 0x116   : > { %v955_v6 = vpack.c.bf16 %v1273_v16, %v412_v2  ;;  %v957_v8 = vpack.c.bf16 %v1254_v10, %v411_v7 }
 0x118   : > { %954 = vmatpush1.bf16.msra.mxu0 %v953_v5 }
 0x119   : > { %956 = vmatprep.subr.bf16.mxu0 %v955_v6 }
 0x11c   : > { %958 = vmatpush1.bf16.msra.mxu0 %v957_v8 }
 0x11d   : > { %459 = vmatprep.subr.mxu0 %v418_v9 }
 0x120   : > { %460 = vmatpush1.msra.mxu0 %v417_v12 }
 0x121   : > { %934 = vmatmul.mubr.msk.f32.vlgmr.msra.gmra.mrb[0].mxu0 %vm439_vm9, %v319_v11 }
 0x1f4   : > { %v1359_v13 = vpop.f32.mrb[0].mxu0 }
 0x1f5   : > { %v1361_v15 = vpop.f32.mrb[1].mxu0 }
 0x1f6   : > { %v514_v10 = vadd.f32 %v1361_v15, %v1359_v13 }
 0x1f8   : > { %515 = vadd.xlane.f32.xlu0 %v514_v10 }
 0x285   : > { %v516_v16 = vpop.xlane.xlu0 %515 }
 0x286   : > { %v517_v17 = vmul.f32 0.00390625, %v516_v16  ;;  %v526_v26 = vrot.slane %v516_v16, 4 }
 0x288   : > { %v518_v18 = vsub.f32 %v1359_v13, %v517_v17  ;;  %v519_v19 = vsub.f32 %v1361_v15, %v517_v17  ;;  %v527_v27 = vadd.f32 %v526_v26, %v516_v16  ;;  %v552_v54 = vmul.f32 %v517_v17, %v1371_v50 }
 0x28a   : > { %v520_v20 = vmul.f32 %v518_v18, %v518_v18  ;;  %v521_v21 = vmul.f32 %v519_v19, %v519_v19  ;;  %v528_v28 = vrot.slane %v527_v27, 2 }
 0x28c   : > { %v522_v24 = vadd.f32 %v521_v21, %v520_v20  ;;  %v529_v29 = vadd.f32 %v528_v28, %v527_v27 }
 0x28e   : > { %523 = vadd.xlane.f32.xlu1 %v522_v24  ;;  %v530_v30 = vrot.slane %v529_v29, 1 }
 0x290   : > { %v531_v31 = vadd.f32 %v530_v30, %v529_v29 }
 0x292   : > { %v532_v33 = vmul.f32 0.00048828125, %v531_v31 }
 0x294   : > { %v533_v34 = vsub.f32 %v517_v17, %v532_v33  ;;  %v554_v53 = vmul.f32 %v1374_v51, %v532_v33 }
 0x296   : > { %v534_v35 = vmul.f32 256.0, %v533_v34 }
 0x298   : > { %v535_v36 = vmul.f32 %v534_v35, %v533_v34 }
 0x31b   : > { %v524_v38 = vpop.xlane.xlu1 %523 }
 0x31c   : > { %v536_v39 = vadd.f32 %v535_v36, %v524_v38  ;;  %v525_v43 = vmul.f32 0.003921569, %v524_v38 }
 0x31e   : > { %v537_v40 = vrot.slane %v536_v39, 4  ;;  %v544_v47 = vadd.f32 1e-05, %v525_v43 }
 0x320   : > { %v538_v41 = vadd.f32 %v537_v40, %v536_v39  ;;  %1062 = vrsqrt.f32 %v544_v47 }
 0x322   : > { %v539_v42 = vrot.slane %v538_v41, 2 }
 0x324   : > { %v540_v44 = vadd.f32 %v539_v42, %v538_v41 }
 0x326   : > { %v541_v45 = vrot.slane %v540_v44, 1 }
 0x328   : > { %v542_v46 = vadd.f32 %v541_v45, %v540_v44 }
 0x32a   : > { %v543_v48 = vmul.f32 0.0004885198, %v542_v46  ;;  %v1063_v52 = vpop.eup %1062 }
 0x32b   : > { %v548_v56 = vmul.f32 %v1063_v52, %v1371_v50  ;;  %v553_v58 = vmul.f32 %v1063_v52, %v552_v54 }
 0x32c   : > { %v546_v49 = vadd.f32 1e-05, %v543_v48 }
 0x32e   : > { %1064 = vrsqrt.f32 %v546_v49 }
 0x338   : > { %v1065_v55 = vpop.eup %1064 }
 0x339   : > { %v550_v57 = vmul.f32 %v1065_v55, %v1374_v51  ;;  %v555_v59 = vmul.f32 %v1065_v55, %v554_v53 }
 0x33b   : > { %v551_v61 = vadd.f32 %v550_v57, %v548_v56  ;;  %v556_v62 = vadd.f32 %v555_v59, %v553_v58 }
 0x33d   : > { %v557_v2 = vmul.f32 %v551_v61, %v1386_v60  ;;  %v558_v4 = vmul.f32 %v556_v62, %v1386_v60 }
 0x33f   : > { %562 = vperm.xlu0 %1040, %v557_v2   ;;  %v559_v5 = vsub.f32 %v1388_v63, %v558_v4 }
 0x341   : > { %569 = vperm.xlu1 %1041, %v559_v5  }
 0x3be   : > { %v563_v6 = vpop.permute.xlu0 %562 }
 0x3bf   : > { %v565_v7 = vmul.f32 %v563_v6, %v1359_v13  ;;  %v566_v8 = vmul.f32 %v563_v6, %v1361_v15 }
 0x3c0   : > { %v570_v9 = vpop.permute.xlu1 %569 }
 0x3c1   : > { %v572_v11 = vadd.f32 %v570_v9, %v565_v7  ;;  %v573_v12 = vadd.f32 %v570_v9, %v566_v8 }
 0x3c3   : > { %v1395_v10 = vmax.f32 %v572_v11, 0.0  ;;  %v575_v16 = vmax.f32 %v573_v12, 0.0 }
 0x3c5   : > { %577 = vrot.lane.b32.xlu1 %v1395_v10, %s1135_s15  ;;  %v1042_v17 = vpack.i.bf16 %v575_v16, %v1395_v10 }
 0x3c7   : > { %1043 = vrot.lane.b32.xlu0 %v1042_v17, %s1137_s17 }
 0x3c9   : > { %579 = vrot.lane.b32.xlu1 %v575_v16, %s1135_s15 }
 0x3cd   : > { %583 = vrot.lane.b32.xlu1 %v1395_v10, %s1134_s14 }
 0x3d1   : > { %585 = vrot.lane.b32.xlu1 %v575_v16, %s1134_s14 }
 0x437   : > { %v578_v13 = vpop.permute.xlu1 %577 }
 0x439   : > { %v1044_v30 = vpop.permute.xlu0 %1043 }
 0x43a   : > { %v1046_v38 = vunpack.i.h.bf16 %v1044_v30  ;;  %v1045_v39 = vunpack.i.l.bf16 %v1044_v30 }
 0x43b   : > { %v580_v15 = vpop.permute.xlu1 %579 }
 0x43c   : > { %v1407_v18 = vsel %vm340_vm1, %v578_v13, %v580_v15  ;;  %v582_v27 = vsel %vm340_vm1, %v580_v15, %v578_v13  ;;  %v619_v52 = vsel %vm357_vm4, %v1045_v39, %v1046_v38  ;;  %v620_v54 = vsel %vm357_vm4, %v1046_v38, %v1045_v39 }
 0x43d   : > { %637 = vrot.lane.b32.xlu0 %v1407_v18, %s1137_s17 }
 0x43f   : > { %v584_v19 = vpop.permute.xlu1 %583 }
 0x441   : > { %643 = vrot.lane.b32.xlu0 %v1407_v18, %s1136_s16 }
 0x443   : > { %v586_v20 = vpop.permute.xlu1 %585 }
 0x444   : > { %v587_v21 = vsel %vm311_vm0, %v584_v19, %v586_v20  ;;  %v588_v24 = vsel %vm311_vm0, %v586_v20, %v584_v19 }
 0x445   : > { %v589_v25 = vsel %vm311_vm0, %v1407_v18, %v588_v24  ;;  %v592_v28 = vsel %vm314_vm2, %v587_v21, %v582_v27 }
 0x446   : > { %v1047_v26 = vpack.i.bf16 %v587_v21, %v589_v25 }
 0x448   : > { %1048 = vrot.lane.b32.xlu1 %v1047_v26, %s1137_s17 }
 0x44c   : > { %1053 = vrot.lane.b32.xlu1 %v1047_v26, %s1136_s16 }
 0x450   : > { %1058 = vrot.lane.b32.xlu1 %v1042_v17, %s1136_s16 }
 0x454   : > { %639 = vrot.lane.b32.xlu1 %v592_v28, %s1137_s17 }
 0x458   : > { %645 = vrot.lane.b32.xlu1 %v592_v28, %s1136_s16  ;;  %s281_s16 = sand.u32 1, %s1124_s22  }
 0x459   : > { %s928_s17 = sshll.u32 %s281_s16, 4  ;;  %s815_s25 = scalar_lea.sflag [#allocation4], %s281_s16 }
 0x45a   : > { %s283_s20 = scalar_lea.vmem [#allocation3], %s928_s17 }
 0x45b   : > { %s829_s26 = sshll.u32 %s283_s20, 4  ;;  %s1499_s26 = int_to_ptr.vmem [resolvable:$true] %s829_s26 }
 0x45c   : > { %s1070_s11 = scalar_lea.vmem %s1499_s26, 256  ;;  %p1077_p0 = scmp.lt.s32.totalorder %s1499_s26, %s1075_s9 }
 0x45d   : > { %p1071_p11 = scmp.ne.s32.totalorder %s1499_s26, %s1070_s11  ;;  %p1078_p1 = scmp.lt.s32.totalorder %s1076_s13, %s1070_s11 }
 0x45f   : > { %p1072_p12 = pnand %p1071_p11, %p1214_p5  ;;  %p1079_p2 = por %p1078_p1, %p1077_p0 }
 0x461   : > { %p1073_p13 = pneg %p1072_p12 }
 0x463   : > { %p1080_p3 = pnand %p1079_p2, %p1073_p13 }
 0x4af   : > { %v638_v53 = vpop.permute.xlu0 %637 }
 0x4b3   : > { %v644_v8 = vpop.permute.xlu0 %643 }
 0x4ba   : > { %v1049_v29 = vpop.permute.xlu1 %1048 }
 0x4bb   : > { %v1051_v31 = vunpack.i.h.bf16 %v1049_v29  ;;  %v1050_v33 = vunpack.i.l.bf16 %v1049_v29 }
 0x4bd   : > { %v598_v40 = vsel %vm357_vm4, %v1051_v31, %v1050_v33  ;;  %v597_v41 = vsel %vm357_vm4, %v1050_v33, %v1051_v31 }
 0x4be   : > { %v1054_v34 = vpop.permute.xlu1 %1053 }
 0x4bf   : > { %v1056_v35 = vunpack.i.h.bf16 %v1054_v34  ;;  %v1055_v36 = vunpack.i.l.bf16 %v1054_v34 }
 0x4c1   : > { %v603_v14 = vsel %vm364_vm3, %v1055_v36, %v1056_v35  ;;  %v604_v42 = vsel %vm364_vm3, %v1056_v35, %v1055_v36 }
 0x4c2   : > { %v1059_v43 = vpop.permute.xlu1 %1058  ;;  %v606_v44 = vsel %vm1287_vm5, %v598_v40, %v603_v14  ;;  %v605_v45 = vsel %vm1291_vm6, %v597_v41, %v604_v42  ;;  %v612_v57 = vsel %vm1303_vm7, %v603_v14, %v598_v40  ;;  %v611_v61 = vsel %vm1311_vm8, %v604_v42, %v597_v41 }
 0x4c3   : > { %v1061_v46 = vunpack.i.h.bf16 %v1059_v43  ;;  %v1060_v47 = vunpack.i.l.bf16 %v1059_v43  ;;  %v959_v48 = vpack.c.bf16 %v587_v21, %v606_v44  ;;  %v961_v49 = vpack.c.bf16 %v589_v25, %v605_v45 }
 0x4c5   : > { %v625_v55 = vsel %vm364_vm3, %v1060_v47, %v1061_v46  ;;  %v626_v56 = vsel %vm364_vm3, %v1061_v46, %v1060_v47  ;;  %960 = vmatprep.subr.bf16.mxu1 %v959_v48 }
 0x4c6   : > { %962 = vmatpush1.bf16.msra.mxu1 %v961_v49  ;;  %v640_v58 = vpop.permute.xlu1 %639  ;;  %v628_v59 = vsel %vm1287_vm5, %v620_v54, %v625_v55  ;;  %v627_v62 = vsel %vm1291_vm6, %v619_v52, %v626_v56  ;;  %v634_v2 = vsel %vm1303_vm7, %v625_v55, %v620_v54  ;;  %v633_v7 = vsel %vm1311_vm8, %v626_v56, %v619_v52 }
 0x4c7   : > { %v963_v4 = vpack.c.bf16 %v628_v59, %v612_v57  ;;  %v965_v5 = vpack.c.bf16 %v627_v62, %v611_v61  ;;  %v967_v6 = vpack.c.bf16 %v634_v2, %v575_v16  ;;  %v642_v11 = vsel %vm357_vm4, %v640_v58, %v638_v53 }
 0x4c8   : > { %v641_v13 = vsel %vm357_vm4, %v638_v53, %v640_v58  ;;  %v969_v15 = vpack.c.bf16 %v633_v7, %v1395_v10 }
 0x4c9   : > { %964 = vmatprep.subr.bf16.mxu1 %v963_v4 }
 0x4ca   : > { %966 = vmatpush1.bf16.msra.mxu1 %v965_v5  ;;  %v646_v9 = vpop.permute.xlu1 %645 }
 0x4cb   : > { %v647_v12 = vsel %vm364_vm3, %v644_v8, %v646_v9  ;;  %v648_v17 = vsel %vm364_vm3, %v646_v9, %v644_v8  ;;  %968 = vmatprep.subr.bf16.mxu1 %v967_v6 }
 0x4cc   : > { %v650_v16 = vsel %vm1287_vm5, %v642_v11, %v647_v12  ;;  %v649_v19 = vsel %vm1291_vm6, %v641_v13, %v648_v17  ;;  %v656_v24 = vsel %vm1303_vm7, %v647_v12, %v642_v11  ;;  %v655_v22 = vsel %vm1311_vm8, %v648_v17, %v641_v13 }
 0x4cd   : > { %v971_v20 = vpack.c.bf16 %v592_v28, %v650_v16  ;;  %v973_v21 = vpack.c.bf16 %v1407_v18, %v649_v19 }
 0x4ce   : > { %970 = vmatpush1.bf16.msra.mxu1 %v969_v15 }
 0x4cf   : > { %972 = vmatprep.subr.bf16.mxu1 %v971_v20 }
 0x4d2   : > { %974 = vmatpush1.bf16.msra.mxu1 %v973_v21 }
 0x4d3   : > { %696 = vmatprep.subr.mxu1 %v656_v24 }
 0x4d6   : > { %697 = vmatpush1.msra.mxu1 %v655_v22 }
 0x4d7   : > { %935 = vmatmul.mubr.msk.f32.vlgmr.msra.gmra.mrb[0].mxu1 %vm439_vm9, %v576_v3 }
 0x5aa   : > { %v746_v23 = vpop.f32.mrb[0].mxu1 }
 0x5ab   : > { %v748_v10 = vpop.f32.mrb[1].mxu1 }
 0x5ac   : > { %v751_v25 = vadd.f32 %v748_v10, %v746_v23 }
 0x5ae   : > { %752 = vadd.xlane.f32.xlu0 %v751_v25 }
 0x63b   : > { %v753_v18 = vpop.xlane.xlu0 %752 }
 0x63c   : > { %v754_v26 = vmul.f32 0.00390625, %v753_v18  ;;  %v763_v31 = vrot.slane %v753_v18, 4 }
 0x63e   : > { %v755_v27 = vsub.f32 %v746_v23, %v754_v26  ;;  %v756_v32 = vsub.f32 %v748_v10, %v754_v26  ;;  %v764_v33 = vadd.f32 %v763_v31, %v753_v18  ;;  %v788_v56 = vmul.f32 %v754_v26, %v1371_v50 }
 0x640   : > { %v757_v28 = vmul.f32 %v755_v27, %v755_v27  ;;  %v758_v29 = vmul.f32 %v756_v32, %v756_v32  ;;  %v765_v34 = vrot.slane %v764_v33, 2 }
 0x642   : > { %v759_v30 = vadd.f32 %v758_v29, %v757_v28  ;;  %v766_v37 = vadd.f32 %v765_v34, %v764_v33 }
 0x644   : > { %760 = vadd.xlane.f32.xlu1 %v759_v30  ;;  %v767_v35 = vrot.slane %v766_v37, 1 }
 0x646   : > { %v768_v36 = vadd.f32 %v767_v35, %v766_v37 }
 0x648   : > { %v769_v38 = vmul.f32 0.00048828125, %v768_v36 }
 0x64a   : > { %v770_v39 = vsub.f32 %v754_v26, %v769_v38  ;;  %v790_v57 = vmul.f32 %v769_v38, %v1374_v51 }
 0x64c   : > { %v771_v40 = vmul.f32 256.0, %v770_v39 }
 0x64e   : > { %v772_v14 = vmul.f32 %v771_v40, %v770_v39 }
 0x6d1   : > { %v761_v41 = vpop.xlane.xlu1 %760 }
 0x6d2   : > { %v773_v42 = vadd.f32 %v772_v14, %v761_v41  ;;  %v762_v46 = vmul.f32 0.003921569, %v761_v41 }
 0x6d4   : > { %v774_v43 = vrot.slane %v773_v42, 4  ;;  %v781_v52 = vadd.f32 1e-05, %v762_v46 }
 0x6d6   : > { %v775_v44 = vadd.f32 %v774_v43, %v773_v42  ;;  %1066 = vrsqrt.f32 %v781_v52 }
 0x6d8   : > { %v776_v45 = vrot.slane %v775_v44, 2 }
 0x6da   : > { %v777_v47 = vadd.f32 %v776_v45, %v775_v44 }
 0x6dc   : > { %v778_v48 = vrot.slane %v777_v47, 1 }
 0x6de   : > { %v779_v49 = vadd.f32 %v778_v48, %v777_v47 }
 0x6e0   : > { %v780_v53 = vmul.f32 0.0004885198, %v779_v49  ;;  %v1067_v55 = vpop.eup %1066 }
 0x6e1   : > { %v785_v59 = vmul.f32 %v1067_v55, %v1371_v50  ;;  %v789_v62 = vmul.f32 %v1067_v55, %v788_v56 }
 0x6e2   : > { %v783_v54 = vadd.f32 1e-05, %v780_v53 }
 0x6e4   : > { %1068 = vrsqrt.f32 %v783_v54 }
 0x6ee   : > { %v1069_v58 = vpop.eup %1068 }
 0x6ef   : > { %v786_v61 = vmul.f32 %v1069_v58, %v1374_v51  ;;  %v791_v2 = vmul.f32 %v1069_v58, %v790_v57 }
 0x6f1   : > { %v787_v4 = vadd.f32 %v786_v61, %v785_v59  ;;  %v792_v5 = vadd.f32 %v791_v2, %v789_v62 }
 0x6f3   : > { %v793_v6 = vmul.f32 %v787_v4, %v1386_v60  ;;  %v794_v7 = vmul.f32 %v792_v5, %v1386_v60 }
 0x6f5   : > { %798 = vperm.xlu0 %1040, %v793_v6   ;;  %v795_v8 = vsub.f32 %v1388_v63, %v794_v7 }
 0x6f7   : > { %805 = vperm.xlu1 %1041, %v795_v8  }
 0x774   : > { %v799_v9 = vpop.permute.xlu0 %798 }
 0x775   : > { %v801_v11 = vmul.f32 %v799_v9, %v746_v23  ;;  %v802_v50 = vmul.f32 %v799_v9, %v748_v10 }
 0x776   : > { %v806_v51 = vpop.permute.xlu1 %805 }
 0x777   : > { %v808_v12 = vadd.f32 %v806_v51, %v801_v11  ;;  %v809_v17 = vadd.f32 %v806_v51, %v802_v50 }
 0x779   : > { %v810_v13 = vadd.f32 %v808_v12, %v1232_v0  ;;  %v811_v60 = vadd.f32 %v809_v17, %v1238_v1 }
 0x77b   : > { %812 = vst [vmem:[%s283_s20] sm:$0xff] %v810_v13  ;;  %813 = vst [vmem:[%s283_s20 + $0x8] sm:$0xff] %v811_v60 }
 0x77c   : > { %1083 = shalt.err (!%p1080_p3)
}
 0x77d   : > { %s1084_s18 = scalar_lea.hbm %s1497_s10, 256  ;;  %s1088_s16 = scalar_lea.hbm %s1545_s6, 512 }
 0x77e   : > { %p1085_p4 = scmp.ne.s32.totalorder %s1497_s10, %s1084_s18  ;;  %p1089_p9 = scmp.lt.u32.totalorder %s1497_s10, %s1545_s6 }
 0x77f   : > { %p1090_p10 = scmp.lt.u32.totalorder %s1088_s16, %s1084_s18  ;;  %p1092_p12 = scmp.lt.u32.totalorder %s1084_s18, %s1497_s10 }
 0x780   : > { %p1086_p7 = pnand %p1085_p4, %p1214_p5 }
 0x781   : > { %p1091_p11 = por %p1090_p10, %p1089_p9 }
 0x782   : > { %p1087_p8 = pneg %p1086_p7 }
 0x783   : > { %p1093_p13 = por %p1092_p12, %p1091_p11 }
 0x785   : > { %p1094_p0 = pnand %p1093_p13, %p1087_p8 }
 0x787   : > { %1097 = shalt.err (!%p1094_p0)
}
 0x788   : > { %975 = dma.vmem_to_hbm [thread:$0]  (%p1214_p5), %s1499_s26, 256, %s1497_s10, %s815_s25  }
 0x789 PF: > { %p981_p1 = scmp.ge.s32.totalorder %s1132_s24, 2  ;;  %s841_s20 = sand.u32 1, %s1120_s21  }
 0x78a   : > { %s842_s28 = scalar_lea.sflag [#allocation4], %s841_s20 }
 0x78b   : > { %p978_p2 = pnand %p981_p1, %p1218_p6 }
 0x78d   : > { %1115 = dma.done.wait (!%p978_p2), %s842_s28, 256  }
 0x78e   : > { %1117 = vsyncadd (!%p978_p2), %s842_s28, 4294967040  ;;  %p16_p3 = scmp.ge.s32.totalorder %s1201_s27, 4   ;;  %s1556_s21 = smov %s1124_s22 }
 0x78f   : > { %s1557_s22 = smov %s1128_s23  ;;  %s1558_s23 = smov %s1212_s30 }
 0x790   : > { %s1559_s24 = smov %s1201_s27  ;;  %18 = sbr.rel (!%p16_p3) target bundleno = 3 (0x3), region = 88 }
 0x797   :  { %847 = vsyncpa [#allocation4], 1 }
 0x798   :  { %849 = vsyncpa [#allocation4 + $0x1], 1 }

</bundles_post_ra>
